<compile_context>
chip_gen: v7x
topology: tpu7x:2x2x1
jax: 0.10.0
libtpu: 0.0.40
codegen_flags: <defaults>
</compile_context>

<pallas_src>
import math
from functools import partial

import jax
import jax.numpy as jnp
from jax.experimental import pallas as pl
from jax.experimental.pallas import tpu as pltpu


def _time_embedding_kernel(t_ref, wt_ref, wp_ref, b_ref, o_ref, *, r):
    # t_ref  : (BLOCK_ROWS, 8)  packed time values; columns >= r are zero pad
    # wt_ref : (8, W)           trend weight scattered block-diagonally (rows >= r zero)
    # wp_ref : (8, W)           period weight, same layout
    # b_ref  : (8, W)           row 0: tiled trend bias, row 1: tiled period bias
    # o_ref  : (BLOCK_ROWS, W)  lane-dense output slab tile
    t = t_ref[...]                                      # (BLOCK_ROWS, 8)
    # Rank-r expansion as exact f32 VPU broadcast-MACs (r <= 8, unrolled).
    zt = t[:, 0:1] * wt_ref[0:1, :] + b_ref[0:1, :]     # (BLOCK_ROWS, W)
    zp = t[:, 0:1] * wp_ref[0:1, :] + b_ref[1:2, :]
    for a in range(1, r):
        ta = t[:, a:a + 1]
        zt = zt + ta * wt_ref[a:a + 1, :]
        zp = zp + ta * wp_ref[a:a + 1, :]
    o_ref[...] = (jnp.maximum(zt, 0.0) + jnp.sin(zp)).astype(o_ref.dtype)


def _round_up(x, m):
    return ((x + m - 1) // m) * m


def _cdiv(a, b):
    return -(-a // b)


def _choose_block_rows(n_slab, lane_w, out_itemsize,
                       tile_budget_bytes=8 * 1024 * 1024, min_blocks=4):
    """Byte-targeted slab-row tile: ~tile_budget of (out + packed-t) per step,
    rounded to the sublane granularity of the output dtype, and capped so the
    grid keeps >= min_blocks steps when the problem is big enough (lets the
    'parallel' axis shard across both v7x TensorCores)."""
    sub = max(8, 32 // out_itemsize)                  # 8 for f32, 16 for bf16
    per_row = lane_w * out_itemsize + 8 * 4           # out row + packed-t row
    br = tile_budget_bytes // per_row
    br = min(br, max(_cdiv(n_slab, min_blocks), sub))
    br = max(sub, (br // sub) * sub)
    return int(br)


def time_embedding(t, w_trend, b_trend, w_period, b_period, *,
                   out_dtype=jnp.float32, block_rows=None):
    """t: (..., 1).  w_*: (dim, 1) or (dim,); b_*: (dim,).  Returns (..., dim)."""
    assert t.shape[-1] == 1, "TimeEmbedding expects a trailing time dim of 1"
    dim = int(w_trend.shape[0])
    lead_shape = t.shape[:-1]
    n = 1
    for s in lead_shape:
        n *= int(s)
    n = max(n, 1)

    # ---- choose slab layout --------------------------------------------
    #   dim % 128 == 0      -> r = 1, W = dim            (plain, no padding)
    #   r = 128/gcd <= 8    -> r rows per slab row, W = r*dim (exact reshape)
    #   otherwise           -> r = 1, W = round_up(dim, 128) (pad + col slice)
    g = math.gcd(dim, 128)
    r = 128 // g
    if r <= 8 and r * dim <= 65536:
        W = r * dim
    else:
        r = 1
        W = _round_up(dim, 128)
    exact_pack = (W == r * dim)

    f32 = jnp.float32
    w_t = jnp.asarray(w_trend, f32).reshape(dim)
    b_t = jnp.asarray(b_trend, f32).reshape(dim)
    w_p = jnp.asarray(w_period, f32).reshape(dim)
    b_p = jnp.asarray(b_period, f32).reshape(dim)

    # Block-diagonal weight scatter + tiled biases, each in an (8, W) resident
    # buffer (sublane aligned; rows sliced straight off the refs in-kernel).
    wt_mat = jnp.zeros((8, W), f32)
    wp_mat = jnp.zeros((8, W), f32)
    bias = jnp.zeros((8, W), f32)
    for a in range(r):
        wt_mat = wt_mat.at[a, a * dim:(a + 1) * dim].set(w_t)
        wp_mat = wp_mat.at[a, a * dim:(a + 1) * dim].set(w_p)
        bias = bias.at[0, a * dim:(a + 1) * dim].set(b_t)
        bias = bias.at[1, a * dim:(a + 1) * dim].set(b_p)

    # ---- pack t into (n_slab_pad, 8) -------------------------------------
    n_slab = _cdiv(n, r)
    out_itemsize = jnp.dtype(out_dtype).itemsize
    if block_rows is None:
        block_rows = _choose_block_rows(n_slab, W, out_itemsize)
    n_blocks = _cdiv(n_slab, block_rows)
    n_slab_pad = n_blocks * block_rows
    n_total = n_slab_pad * r

    t_flat = jnp.asarray(t, f32).reshape(n)
    if n_total != n:
        t_flat = jnp.pad(t_flat, (0, n_total - n))
    t_slab = t_flat.reshape(n_slab_pad, r)
    if r < 8:
        t_slab = jnp.pad(t_slab, ((0, 0), (0, 8 - r)))

    # VMEM: double-buffered (out + t) tiles + 3 resident (8, W) param buffers.
    footprint = 2 * block_rows * (W * out_itemsize + 8 * 4) + 3 * 8 * W * 4
    vmem_limit = int(min(48 * 1024 * 1024,             # < v7x 64 MiB physical
                         max(32 * 1024 * 1024, footprint * 5 // 4)))

    out_slab = pl.pallas_call(
        partial(_time_embedding_kernel, r=r),
        out_shape=jax.ShapeDtypeStruct((n_slab_pad, W), out_dtype),
        grid_spec=pltpu.PrefetchScalarGridSpec(
            num_scalar_prefetch=0,
            grid=(n_blocks,),
            in_specs=[
                pl.BlockSpec((block_rows, 8), lambda i: (i, 0)),
                pl.BlockSpec((8, W), lambda i: (0, 0)),     # resident params
                pl.BlockSpec((8, W), lambda i: (0, 0)),
                pl.BlockSpec((8, W), lambda i: (0, 0)),
            ],
            out_specs=pl.BlockSpec((block_rows, W), lambda i: (i, 0)),
        ),
        compiler_params=pltpu.CompilerParams(
            dimension_semantics=("parallel",),
            vmem_limit_bytes=vmem_limit,
        ),
    )(t_slab, wt_mat, wp_mat, bias)

    # ---- unpack (skip slices/reshapes that would be no-ops) --------------
    if exact_pack:
        out2d = out_slab.reshape(n_total, dim)   # pure row-major reshape (free)
    else:
        out2d = out_slab[:, :dim]                # fallback: drop padded columns
    if out2d.shape[0] != n:
        out2d = out2d[:n]
    return out2d.reshape(*lead_shape, dim)


def time_embedding_ref(t, w_trend, b_trend, w_period, b_period):
    """Pure-JAX reference mirroring the PyTorch forward."""
    trend = jax.nn.relu(t @ w_trend.T + b_trend)
    period = jnp.sin(t @ w_period.T + b_period)
    return trend + period


if __name__ == "__main__":
    key = jax.random.PRNGKey(0)
    k_t, k_wt, k_bt, k_wp, k_bp = jax.random.split(key, 5)

    # --- dim = 32: exercises the packed slab path (r = 4) -----------------
    batch, seq, dim = 2, 8, 32
    w_trend = jax.random.normal(k_wt, (dim, 1), dtype=jnp.float32)
    b_trend = jax.random.normal(k_bt, (dim,), dtype=jnp.float32)
    w_period = jax.random.normal(k_wp, (dim, 1), dtype=jnp.float32)
    b_period = jax.random.normal(k_bp, (dim,), dtype=jnp.float32)
    t = jax.random.normal(k_t, (batch, seq, 1), dtype=jnp.float32)

    out = time_embedding(t, w_trend, b_trend, w_period, b_period)
    out = jax.block_until_ready(out)
    ref = time_embedding_ref(t, w_trend, b_trend, w_period, b_period)
    assert out.shape == (batch, seq, dim), out.shape
    assert jnp.allclose(out, ref, atol=1e-5, rtol=1e-5), "mismatch vs reference (dim=32)"

    # --- dim = 128: exercises the r = 1 (plain lane-dense) path ------------
    dim2 = 128
    k2 = jax.random.split(key, 4)
    w_t2 = jax.random.normal(k2[0], (dim2, 1), dtype=jnp.float32)
    b_t2 = jax.random.normal(k2[1], (dim2,), dtype=jnp.float32)
    w_p2 = jax.random.normal(k2[2], (dim2, 1), dtype=jnp.float32)
    b_p2 = jax.random.normal(k2[3], (dim2,), dtype=jnp.float32)
    t2 = jax.random.normal(k_t, (4, 16, 1), dtype=jnp.float32)

    out2 = time_embedding(t2, w_t2, b_t2, w_p2, b_p2)
    out2 = jax.block_until_ready(out2)
    ref2 = time_embedding_ref(t2, w_t2, b_t2, w_p2, b_p2)
    assert out2.shape == (4, 16, dim2), out2.shape
    assert jnp.allclose(out2, ref2, atol=1e-5, rtol=1e-5), "mismatch vs reference (dim=128)"

    print("KERNEL_OK")
</pallas_src>

<mosaic_0001>
module attributes {stable_mosaic.version = 11 : i64} {
  func.func @_time_embedding_kernel(%arg0: i32, %arg1: memref<8x8xf32, #tpu.memory_space<vmem>>, %arg2: memref<8x128xf32, #tpu.memory_space<vmem>>, %arg3: memref<8x128xf32, #tpu.memory_space<vmem>>, %arg4: memref<8x128xf32, #tpu.memory_space<vmem>>, %arg5: memref<8x128xf32, #tpu.memory_space<vmem>>) attributes {dimension_semantics = [#tpu.dimension_semantics<parallel>], iteration_bounds = array<i64: 1>, scalar_prefetch = 0 : i64, scratch_operands = 0 : i64, tpu.core_type = #tpu.core_type<tc>, window_params = [{transform_indices = @transform_0, window_bounds = array<i64: 8, 8>}, {pipeline_mode = #tpu.pipeline_mode<synchronous>, transform_indices = @transform_1, window_bounds = array<i64: 8, 128>}, {pipeline_mode = #tpu.pipeline_mode<synchronous>, transform_indices = @transform_2, window_bounds = array<i64: 8, 128>}, {pipeline_mode = #tpu.pipeline_mode<synchronous>, transform_indices = @transform_3, window_bounds = array<i64: 8, 128>}, {transform_indices = @transform_4, window_bounds = array<i64: 8, 128>}]} {
    %c0 = arith.constant 0 : index
    %c0_0 = arith.constant 0 : index
    %0 = vector.load %arg1[%c0, %c0_0] : memref<8x8xf32, #tpu.memory_space<vmem>>, vector<8x8xf32>
    %1 = vector.extract_strided_slice %0 {offsets = [0, 0], sizes = [8, 1], strides = [1, 1]} : vector<8x8xf32> to vector<8x1xf32>
    %c0_1 = arith.constant 0 : index
    %c0_2 = arith.constant 0 : index
    %2 = vector.load %arg2[%c0_1, %c0_2] : memref<8x128xf32, #tpu.memory_space<vmem>>, vector<1x128xf32>
    %3 = vector.broadcast %1 : vector<8x1xf32> to vector<8x128xf32>
    %4 = vector.broadcast %2 : vector<1x128xf32> to vector<8x128xf32>
    %5 = arith.mulf %3, %4 : vector<8x128xf32>
    %c0_3 = arith.constant 0 : index
    %c0_4 = arith.constant 0 : index
    %6 = vector.load %arg4[%c0_3, %c0_4] : memref<8x128xf32, #tpu.memory_space<vmem>>, vector<1x128xf32>
    %7 = vector.broadcast %6 : vector<1x128xf32> to vector<8x128xf32>
    %8 = arith.addf %5, %7 : vector<8x128xf32>
    %9 = vector.extract_strided_slice %0 {offsets = [0, 0], sizes = [8, 1], strides = [1, 1]} : vector<8x8xf32> to vector<8x1xf32>
    %c0_5 = arith.constant 0 : index
    %c0_6 = arith.constant 0 : index
    %10 = vector.load %arg3[%c0_5, %c0_6] : memref<8x128xf32, #tpu.memory_space<vmem>>, vector<1x128xf32>
    %11 = vector.broadcast %9 : vector<8x1xf32> to vector<8x128xf32>
    %12 = vector.broadcast %10 : vector<1x128xf32> to vector<8x128xf32>
    %13 = arith.mulf %11, %12 : vector<8x128xf32>
    %c1 = arith.constant 1 : index
    %c0_7 = arith.constant 0 : index
    %14 = vector.load %arg4[%c1, %c0_7] : memref<8x128xf32, #tpu.memory_space<vmem>>, vector<1x128xf32>
    %15 = vector.broadcast %14 : vector<1x128xf32> to vector<8x128xf32>
    %16 = arith.addf %13, %15 : vector<8x128xf32>
    %17 = vector.extract_strided_slice %0 {offsets = [0, 1], sizes = [8, 1], strides = [1, 1]} : vector<8x8xf32> to vector<8x1xf32>
    %c1_8 = arith.constant 1 : index
    %c0_9 = arith.constant 0 : index
    %18 = vector.load %arg2[%c1_8, %c0_9] : memref<8x128xf32, #tpu.memory_space<vmem>>, vector<1x128xf32>
    %19 = vector.broadcast %17 : vector<8x1xf32> to vector<8x128xf32>
    %20 = vector.broadcast %18 : vector<1x128xf32> to vector<8x128xf32>
    %21 = arith.mulf %19, %20 : vector<8x128xf32>
    %22 = arith.addf %8, %21 : vector<8x128xf32>
    %c1_10 = arith.constant 1 : index
    %c0_11 = arith.constant 0 : index
    %23 = vector.load %arg3[%c1_10, %c0_11] : memref<8x128xf32, #tpu.memory_space<vmem>>, vector<1x128xf32>
    %24 = vector.broadcast %17 : vector<8x1xf32> to vector<8x128xf32>
    %25 = vector.broadcast %23 : vector<1x128xf32> to vector<8x128xf32>
    %26 = arith.mulf %24, %25 : vector<8x128xf32>
    %27 = arith.addf %16, %26 : vector<8x128xf32>
    %28 = vector.extract_strided_slice %0 {offsets = [0, 2], sizes = [8, 1], strides = [1, 1]} : vector<8x8xf32> to vector<8x1xf32>
    %c2 = arith.constant 2 : index
    %c0_12 = arith.constant 0 : index
    %29 = vector.load %arg2[%c2, %c0_12] : memref<8x128xf32, #tpu.memory_space<vmem>>, vector<1x128xf32>
    %30 = vector.broadcast %28 : vector<8x1xf32> to vector<8x128xf32>
    %31 = vector.broadcast %29 : vector<1x128xf32> to vector<8x128xf32>
    %32 = arith.mulf %30, %31 : vector<8x128xf32>
    %33 = arith.addf %22, %32 : vector<8x128xf32>
    %c2_13 = arith.constant 2 : index
    %c0_14 = arith.constant 0 : index
    %34 = vector.load %arg3[%c2_13, %c0_14] : memref<8x128xf32, #tpu.memory_space<vmem>>, vector<1x128xf32>
    %35 = vector.broadcast %28 : vector<8x1xf32> to vector<8x128xf32>
    %36 = vector.broadcast %34 : vector<1x128xf32> to vector<8x128xf32>
    %37 = arith.mulf %35, %36 : vector<8x128xf32>
    %38 = arith.addf %27, %37 : vector<8x128xf32>
    %39 = vector.extract_strided_slice %0 {offsets = [0, 3], sizes = [8, 1], strides = [1, 1]} : vector<8x8xf32> to vector<8x1xf32>
    %c3 = arith.constant 3 : index
    %c0_15 = arith.constant 0 : index
    %40 = vector.load %arg2[%c3, %c0_15] : memref<8x128xf32, #tpu.memory_space<vmem>>, vector<1x128xf32>
    %41 = vector.broadcast %39 : vector<8x1xf32> to vector<8x128xf32>
    %42 = vector.broadcast %40 : vector<1x128xf32> to vector<8x128xf32>
    %43 = arith.mulf %41, %42 : vector<8x128xf32>
    %44 = arith.addf %33, %43 : vector<8x128xf32>
    %c3_16 = arith.constant 3 : index
    %c0_17 = arith.constant 0 : index
    %45 = vector.load %arg3[%c3_16, %c0_17] : memref<8x128xf32, #tpu.memory_space<vmem>>, vector<1x128xf32>
    %46 = vector.broadcast %39 : vector<8x1xf32> to vector<8x128xf32>
    %47 = vector.broadcast %45 : vector<1x128xf32> to vector<8x128xf32>
    %48 = arith.mulf %46, %47 : vector<8x128xf32>
    %49 = arith.addf %38, %48 : vector<8x128xf32>
    %cst = arith.constant 0.000000e+00 : f32
    %50 = vector.broadcast %cst : f32 to vector<8x128xf32>
    %51 = arith.maximumf %44, %50 : vector<8x128xf32>
    %52 = math.sin %49 : vector<8x128xf32>
    %53 = arith.addf %51, %52 : vector<8x128xf32>
    %c0_18 = arith.constant 0 : index
    %c0_19 = arith.constant 0 : index
    %54 = vector.load %arg5[%c0_18, %c0_19] : memref<8x128xf32, #tpu.memory_space<vmem>>, vector<8x128xf32>
    tpu.vector_store %arg5[%c0_18, %c0_19], %53 {strides = array<i32>} : memref<8x128xf32, #tpu.memory_space<vmem>>, vector<8x128xf32>,
    return
  }
  func.func @transform_0(%arg0: i32) -> (i32, i32) {
    %c0_i32 = arith.constant 0 : i32
    %c0_i32_0 = arith.constant 0 : i32
    return %arg0, %c0_i32 : i32, i32
  }
  func.func @transform_1(%arg0: i32) -> (i32, i32) {
    %c0_i32 = arith.constant 0 : i32
    %c0_i32_0 = arith.constant 0 : i32
    %c0_i32_1 = arith.constant 0 : i32
    return %c0_i32, %c0_i32_0 : i32, i32
  }
  func.func @transform_2(%arg0: i32) -> (i32, i32) {
    %c0_i32 = arith.constant 0 : i32
    %c0_i32_0 = arith.constant 0 : i32
    %c0_i32_1 = arith.constant 0 : i32
    return %c0_i32, %c0_i32_0 : i32, i32
  }
  func.func @transform_3(%arg0: i32) -> (i32, i32) {
    %c0_i32 = arith.constant 0 : i32
    %c0_i32_0 = arith.constant 0 : i32
    %c0_i32_1 = arith.constant 0 : i32
    return %c0_i32, %c0_i32_0 : i32, i32
  }
  func.func @transform_4(%arg0: i32) -> (i32, i32) {
    %c0_i32 = arith.constant 0 : i32
    %c0_i32_0 = arith.constant 0 : i32
    return %arg0, %c0_i32 : i32, i32
  }
}

</mosaic_0001>

<bundles_post_ra>
// kernel: tpu_custom_call.1
= control target key start
LH: loop header
LB: loop body
LE: loop exit
PB: predicated region body
PF: predicated region fallthrough
CT: control target
= control target key end

     0   :  { %9 = vsyncpa [#allocation3], 0  ;;  %s512_s0 = inlined_call_operand.hbm [shape: f32[8,8], index: 0, kind: input, shape index: {}]   ;;  %s513_s1 = inlined_call_operand.hbm [shape: f32[8,128], index: 1, kind: input, shape index: {}]   ;;  %s514_s2 = inlined_call_operand.hbm [shape: f32[8,128], index: 2, kind: input, shape index: {}]   ;;  %s515_s3 = inlined_call_operand.vmem [shape: f32[8,128], index: 3, kind: input, shape index: {}]   ;;  %s516_s4 = inlined_call_operand.hbm [shape: f32[8,128], index: 4, kind: output, shape index: {}]  }
   0x1   :  { %10 = vsyncpa [#allocation6], 0 }
   0x2   :  { %11 = vsyncpa [#allocation4], 0  ;;  %s395_s15 = smov [#allocation5]   ;;  %s396_s17 = smov [#allocation2]  }
   0x3   :  { %s28_s16 = sshll.u32 %s395_s15, 4  ;;  %s18_s18 = sshll.u32 %s396_s17, 4  ;;  %s29_s16 = int_to_ptr.vmem [resolvable:$true] %s28_s16  ;;  %s19_s18 = int_to_ptr.vmem [resolvable:$true] %s18_s18 }
   0x4   :  { %s301_s21 = scalar_lea.hbm %s513_s1, 128 }
   0x5   :  { %p302_p0 = scmp.ne.s32.totalorder %s513_s1, %s301_s21  ;;  %p305_p1 = scmp.lt.u32.totalorder %s301_s21, %s513_s1 }
   0x7   :  { %p307_p2 = pnand %p305_p1, %p302_p0 }
   0x9   :  { %310 = shalt.err (!%p307_p2)
}
   0xa   :  { %s311_s26 = scalar_lea.vmem %s29_s16, 128  ;;  %p316_p4 = scmp.lt.s32.totalorder %s29_s16, %s29_s16 }
   0xb   :  { %p312_p3 = scmp.ne.s32.totalorder %s29_s16, %s311_s26  ;;  %p317_p5 = scmp.lt.s32.totalorder %s311_s26, %s311_s26 }
   0xd   :  { %p318_p6 = por %p317_p5, %p316_p4 }
   0xf   :  { %p319_p7 = pnand %p318_p6, %p312_p3 }
  0x11   :  { %322 = shalt.err (!%p319_p7)
}
  0x12   :  { %31 = dma.hbm_to_vmem [thread:$0]  %s513_s1, 128, %s29_s16, [#allocation6]  }
  0x13   :  { %s323_s5 = scalar_lea.hbm %s512_s0, 128 }
  0x14   :  { %p324_p8 = scmp.ne.s32.totalorder %s512_s0, %s323_s5  ;;  %p327_p9 = scmp.lt.u32.totalorder %s323_s5, %s512_s0 }
  0x16   :  { %p329_p10 = pnand %p327_p9, %p324_p8 }
  0x18   :  { %332 = shalt.err (!%p329_p10)
}
  0x19   :  { %s333_s10 = scalar_lea.vmem %s19_s18, 128  ;;  %p338_p12 = scmp.lt.s32.totalorder %s19_s18, %s19_s18 }
  0x1a   :  { %p334_p11 = scmp.ne.s32.totalorder %s19_s18, %s333_s10  ;;  %p339_p13 = scmp.lt.s32.totalorder %s333_s10, %s333_s10 }
  0x1c   :  { %p340_p0 = por %p339_p13, %p338_p12 }
  0x1e   :  { %p341_p1 = pnand %p340_p0, %p334_p11 }
  0x20   :  { %344 = shalt.err (!%p341_p1)
}
  0x21   :  { %21 = dma.hbm_to_vmem [thread:$0]  %s512_s0, 128, %s19_s18, [#allocation3]  }
  0x22   :  { %s397_s12 = smov [#allocation7]   ;;  %s345_s16 = scalar_lea.hbm %s514_s2, 128 }
  0x23   :  { %s38_s13 = sshll.u32 %s397_s12, 4  ;;  %p346_p2 = scmp.ne.s32.totalorder %s514_s2, %s345_s16  ;;  %s39_s13 = int_to_ptr.vmem [resolvable:$true] %s38_s13 }
  0x24   :  { %p349_p3 = scmp.lt.u32.totalorder %s345_s16, %s514_s2 }
  0x26   :  { %p351_p4 = pnand %p349_p3, %p346_p2 }
  0x28   :  { %354 = shalt.err (!%p351_p4)
}
  0x29   :  { %s355_s22 = scalar_lea.vmem %s39_s13, 128  ;;  %p360_p6 = scmp.lt.s32.totalorder %s39_s13, %s39_s13 }
  0x2a   :  { %p356_p5 = scmp.ne.s32.totalorder %s39_s13, %s355_s22  ;;  %p361_p7 = scmp.lt.s32.totalorder %s355_s22, %s355_s22 }
  0x2c   :  { %p362_p8 = por %p361_p7, %p360_p6 }
  0x2e   :  { %p363_p9 = pnand %p362_p8, %p356_p5 }
  0x30   :  { %366 = shalt.err (!%p363_p9)
}
  0x31   :  { %41 = dma.hbm_to_vmem [thread:$0]  %s514_s2, 128, %s39_s13, [#allocation6]  }
  0x32   :  { %389 = dma.done.wait [#allocation3], 128  }
  0x33   :  { %390 = vsyncadd [#allocation3], 4294967168 }
  0x34   :  { %391 = dma.done.wait [#allocation6], 256  }
  0x35   :  { %392 = vsyncadd [#allocation6], 4294967040  ;;  %v398_v0 = vmov 0   ;;  %v399_v1 = vmov 2   ;;  %v53_v2 = vld [vmem:[#allocation2] sm:$0xff]  ;;  %v400_v3 = vmov 1  }
  0x36   :  { %292 = vset.pattern.permute.xlu0 %v398_v0  ;;  %294 = vset.pattern.permute.xlu1 %v399_v1  ;;  %v401_v4 = vmov 3   ;;  %v260_v5 = vld [vmem:[#allocation5] ss:$0 sm:$0xff]  ;;  %v262_v6 = vld [vmem:[#allocation7] ss:$0 sm:$0xff] }
  0x37   :  { %57 = vperm.xlu0 %292, %v53_v2   ;;  %103 = vperm.xlu1 %294, %v53_v2   ;;  %v261_v9 = vld [vmem:[%s515_s3] ss:$0 sm:$0xff]  ;;  %v263_v12 = vld [vmem:[%s515_s3 + $0x1] ss:$0 sm:$0xff]  ;;  %v264_v13 = vld [vmem:[#allocation5 + $0x1] ss:$0 sm:$0xff] }
  0x38   :  { %v265_v14 = vld [vmem:[#allocation7 + $0x1] ss:$0 sm:$0xff]  ;;  %v266_v15 = vld [vmem:[#allocation5 + $0x2] ss:$0 sm:$0xff]  ;;  %v267_v16 = vld [vmem:[#allocation7 + $0x2] ss:$0 sm:$0xff] }
  0x39   :  { %v268_v18 = vld [vmem:[#allocation5 + $0x3] ss:$0 sm:$0xff]  ;;  %v269_v19 = vld [vmem:[#allocation7 + $0x3] ss:$0 sm:$0xff]  ;;  %v402_v45 = vmov 683565275  }
  0x3a   :  { %v403_v47 = vmov 2475754826   ;;  %v404_v50 = vmov 2131351028   ;;  %v405_v53 = vmov 2102212464  }
  0x3b   :  { %293 = vset.pattern.permute.xlu0 %v400_v3  ;;  %295 = vset.pattern.permute.xlu1 %v401_v4  ;;  %v406_v56 = vmov 920167782   ;;  %v407_v59 = vmov 1326507024   ;;  %s408_s3 = smov [#allocation8]  }
  0x3c   :  { %85 = vperm.xlu0 %293, %v53_v2   ;;  %121 = vperm.xlu1 %295, %v53_v2   ;;  %s250_s26 = sshll.u32 %s408_s3, 4  ;;  %s251_s26 = int_to_ptr.vmem [resolvable:$true] %s250_s26 }
  0x3d   :  { %s367_s27 = scalar_lea.vmem %s251_s26, 128  ;;  %p372_p11 = scmp.lt.s32.totalorder %s251_s26, %s251_s26 }
  0x3e   :  { %p368_p10 = scmp.ne.s32.totalorder %s251_s26, %s367_s27  ;;  %p373_p12 = scmp.lt.s32.totalorder %s367_s27, %s367_s27 }
  0x40   :  { %296 = vset.pattern.permute.xlu0 %v401_v4  ;;  %p374_p13 = por %p373_p12, %p372_p11 }
  0x42   :  { %p375_p0 = pnand %p374_p13, %p368_p10 }
  0xb6   :  { %v58_v7 = vpop.permute.xlu0 %57  ;;  %v104_v8 = vpop.permute.xlu1 %103 }
  0xb7   :  { %v64_v10 = vmul.f32 %v260_v5, %v58_v7  ;;  %v76_v11 = vmul.f32 %v262_v6, %v58_v7  ;;  %v110_v25 = vmul.f32 %v266_v15, %v104_v8  ;;  %v117_v26 = vmul.f32 %v267_v16, %v104_v8 }
  0xb9   :  { %v70_v21 = vadd.f32 %v261_v9, %v64_v10  ;;  %v82_v22 = vadd.f32 %v263_v12, %v76_v11 }
  0xbb   :  { %v86_v17 = vpop.permute.xlu0 %85  ;;  %v122_v20 = vpop.permute.xlu1 %121 }
  0xbc   :  { %v92_v23 = vmul.f32 %v264_v13, %v86_v17  ;;  %v99_v24 = vmul.f32 %v265_v14, %v86_v17  ;;  %v128_v29 = vmul.f32 %v268_v18, %v122_v20  ;;  %v135_v30 = vmul.f32 %v269_v19, %v122_v20 }
  0xbe   :  { %v93_v27 = vadd.f32 %v92_v23, %v70_v21  ;;  %v100_v28 = vadd.f32 %v99_v24, %v82_v22 }
  0xc0   :  { %v111_v31 = vadd.f32 %v110_v25, %v93_v27  ;;  %v118_v32 = vadd.f32 %v117_v26, %v100_v28 }
  0xc2   :  { %v476_v33 = vadd.f32 %v128_v29, %v111_v31  ;;  %v478_v34 = vadd.f32 %v135_v30, %v118_v32 }
  0xc4   :  { %v141_v35 = vand.u32 2139095040, %v478_v34  ;;  %v138_v39 = vand.u32 2147483647, %v478_v34  ;;  %vm140_vm7 = vcmp.lt.s32.totalorder %v478_v34, 0  ;;  %vm230_vm12 = vweird.f32 %v478_v34 }
  0xc6   :  { %v142_v36 = vshrl.u32 %v141_v35, 23  ;;  %v145_v42 = vand.u32 8388607, %v138_v39  ;;  %vm139_vm8 = vcmp.le.f32.partialorder %v138_v39, 0.7853982  ;;  %v137_v39 = vmax.f32 %v476_v33, 0.0 }
  0xc8   :  { %v270_v37 = vadd.s32 4294967169, %v142_v36  ;;  %v146_v61 = vor.u32 8388608, %v145_v42 }
  0xca   :  { %v148_v38 = vadd.s32 1, %v270_v37  ;;  %v186_v11 = vshll.u32 %v146_v61, 8 }
  0xcc   :  { %vm149_vm0 = vcmp.gt.s32.totalorder %v148_v38, 0 }
  0xcd   :  { %v150_v40 = vsel %vm149_vm0, %v148_v38, 0 }
  0xce   :  { %v152_v41 = vand.u32 31, %v150_v40  ;;  %v151_v44 = vshrl.u32 %v150_v40, 5 }
  0xd0   :  { %v153_v43 = vsub.s32 32, %v152_v41  ;;  %v155_v46 = vshll.u32 %v402_v45, %v152_v41  ;;  %v158_v48 = vshll.u32 %v403_v47, %v152_v41  ;;  %v161_v52 = vshll.u32 %v404_v50, %v152_v41 }
  0xd1   :  { %v164_v55 = vshll.u32 %v405_v53, %v152_v41  ;;  %v167_v58 = vshll.u32 %v406_v56, %v152_v41  ;;  %vm170_vm1 = vcmp.lt.s32.totalorder %v151_v44, 1  ;;  %vm173_vm2 = vcmp.lt.s32.totalorder %v151_v44, 4 }
  0xd2   :  { %v156_v49 = vshrl.u32 %v403_v47, %v153_v43  ;;  %v159_v51 = vshrl.u32 %v404_v50, %v153_v43  ;;  %v162_v54 = vshrl.u32 %v405_v53, %v153_v43  ;;  %v165_v57 = vshrl.u32 %v406_v56, %v153_v43 }
  0xd3   :  { %v168_v60 = vshrl.u32 %v407_v59, %v153_v43  ;;  %v154_v6 = vshrl.u32 %v402_v45, %v153_v43  ;;  %vm172_vm3 = vcmp.lt.s32.totalorder %v151_v44, 3  ;;  %vm171_vm4 = vcmp.lt.s32.totalorder %v151_v44, 2 }
  0xd4   :  { %v157_v62 = vor.u32 %v156_v49, %v155_v46  ;;  %v160_v63 = vor.u32 %v159_v51, %v158_v48  ;;  %v163_v0 = vor.u32 %v162_v54, %v161_v52  ;;  %v166_v1 = vor.u32 %v165_v57, %v164_v55 }
  0xd5   :  { %v169_v2 = vor.u32 %v168_v60, %v167_v58 }
  0xd6   :  { %v175_v3 = vsel %vm173_vm2, %v163_v0, 2102212464  ;;  %v178_v4 = vsel %vm170_vm1, %v157_v62, %v160_v63  ;;  %v182_v5 = vsel %vm170_vm1, %v160_v63, %v163_v0  ;;  %v179_v7 = vsel %vm173_vm2, %v166_v1, 920167782 }
  0xd7   :  { %v183_v8 = vsel %vm173_vm2, %v169_v2, 1326507024  ;;  %v180_v9 = vsel %vm172_vm3, %v163_v0, %v179_v7  ;;  %v174_v12 = vsel %vm170_vm1, %v154_v6, %v157_v62  ;;  %v176_v13 = vsel %vm172_vm3, %v160_v63, %v175_v3 }
  0xd8   :  { %v184_v10 = vsel %vm172_vm3, %v166_v1, %v183_v8  ;;  %v181_v14 = vsel %vm171_vm4, %v178_v4, %v180_v9  ;;  %v177_v20 = vsel %vm171_vm4, %v174_v12, %v176_v13 }
  0xd9   :  { %v185_v15 = vsel %vm171_vm4, %v182_v5, %v184_v10  ;;  %v487_v18 = vmul.u32.u64.low %v186_v11, %v181_v14  ;;  %v488_v19 = vmul.u32.u64.high %v186_v11, %v181_v14, %v487_v18  ;;  %v193_v22 = vmul.u32 %v186_v11, %v177_v20 }
  0xda   :  { %v484_v16 = vmul.u32.u64.low %v186_v11, %v185_v15  ;;  %v485_v17 = vmul.u32.u64.high %v186_v11, %v185_v15, %v484_v16 }
  0xdb   :  { %v196_v21 = vadd.s32 1, %v488_v19 }
  0xdc   :  { %vm195_vm5 = vc.u32 %v485_v17, %v487_v18  ;;  %v194_v36 = vadd.s32 %v487_v18, %v485_v17 }
  0xdd   :  { %v197_v23 = vsel %vm195_vm5, %v196_v21, %v488_v19 }
  0xde   :  { %v198_v24 = vadd.s32 %v197_v23, %v193_v22 }
  0xe0   :  { %v199_v25 = vadd.s32 536870912, %v198_v24 }
  0xe2   :  { %v200_v26 = vshrl.u32 %v199_v25, 30 }
  0xe4   :  { %v201_v27 = vshll.u32 %v200_v26, 30  ;;  %v224_v49 = vsub.s32 4, %v200_v26 }
  0xe6   :  { %v202_v28 = vsub.s32 %v198_v24, %v201_v27  ;;  %v225_v52 = vsel %vm140_vm7, %v224_v49, %v200_v26 }
  0xe7   :  { %v227_v54 = vsel %vm139_vm8, 0, %v225_v52 }
  0xe8   :  { %v204_v29 = vsub.s32 0, %v202_v28  ;;  %v231_v55 = vadd.s32 3, %v227_v54 }
  0xea   :  { %v271_v30 = vmin.u32 %v204_v29, %v202_v28  ;;  %v232_v56 = vand.u32 3, %v231_v55 }
  0xec   :  { %v206_v31 = vclz %v271_v30  ;;  %vm237_vm9 = vcmp.eq.s32.totalorder %v232_v56, 2  ;;  %vm234_vm10 = vcmp.eq.s32.totalorder %v232_v56, 0  ;;  %vm233_vm11 = vcmp.lt.s32.totalorder %v232_v56, 2 }
  0xee   :  { %v272_v32 = vadd.s32 4294967294, %v206_v31 }
  0xf0   :  { %vm273_vm6 = vcmp.lt.s32.totalorder %v272_v32, 0 }
  0xf1   :  { %v209_v35 = vsel %vm273_vm6, 0, %v272_v32 }
  0xf2   :  { %v210_v37 = vsub.s32 32, %v209_v35  ;;  %v214_v38 = vsub.s32 4294967266, %v209_v35  ;;  %v211_v40 = vshll.u32 %v202_v28, %v209_v35 }
  0xf4   :  { %v212_v41 = vshrl.u32 %v194_v36, %v210_v37  ;;  %v215_v42 = vadd.s32 127, %v214_v38 }
  0xf6   :  { %v213_v43 = vor.u32 %v212_v41, %v211_v40  ;;  %v216_v44 = vshll.u32 %v215_v42, 23 }
  0xf8   :  { %v217_v45 = vor.u32 4788187, %v216_v44  ;;  %v220_v47 = vcvt.s32.f32 %v213_v43 }
  0xfa   :  { %v218_v46 = vand.u32 2147483647, %v217_v45 }
  0xfc   :  { %v221_v48 = vmul.f32 %v220_v47, %v218_v46 }
  0xfe   :  { %v222_v50 = vxor.u32 2147483648, %v221_v48 }
 0x100   :  { %v223_v51 = vsel %vm140_vm7, %v222_v50, %v221_v48 }
 0x101   :  { %v226_v53 = vsel %vm139_vm8, %v478_v34, %v223_v51 }
 0x102   :  { %297 = vcosq.f32 %v226_v53 }
 0x103   :  { %299 = vsinq.f32 %v226_v53 }
 0x10c   :  { %v298_v57 = vpop.eup %297 }
 0x10d   :  { %v300_v58 = vpop.eup %299  ;;  %v238_v59 = vxor.u32 2147483648, %v298_v57 }
 0x10e   :  { %v235_v60 = vxor.u32 2147483648, %v300_v58 }
 0x10f   :  { %v239_v61 = vsel %vm237_vm9, %v238_v59, %v300_v58 }
 0x110   :  { %v236_v62 = vsel %vm234_vm10, %v298_v57, %v235_v60 }
 0x111   :  { %v240_v63 = vsel %vm233_vm11, %v236_v62, %v239_v61 }
 0x112   :  { %v241_v0 = vsel %vm230_vm12, nan, %v240_v63 }
 0x113   :  { %v242_v1 = vadd.f32 %v241_v0, %v137_v39 }
 0x115   :  { %243 = vst [vmem:[#allocation8] sm:$0xff] %v242_v1 }
 0x116   :  { %378 = shalt.err (!%p375_p0)
}
 0x117   :  { %s379_s30 = scalar_lea.hbm %s516_s4, 128 }
 0x118   :  { %p380_p1 = scmp.ne.s32.totalorder %s516_s4, %s379_s30  ;;  %p383_p2 = scmp.lt.u32.totalorder %s379_s30, %s516_s4 }
 0x11a   :  { %p385_p3 = pnand %p383_p2, %p380_p1 }
 0x11c   :  { %388 = shalt.err (!%p385_p3)
}
 0x11d   :  { %253 = dma.vmem_to_hbm [thread:$0]  %s251_s26, 128, %s516_s4, [#allocation4]  }
 0x11e   :  { %393 = dma.done.wait [#allocation4], 128  }
 0x11f   :  { %394 = vsyncadd [#allocation4], 4294967168 }
 0x120   :  { %257 = vsyncpa [#allocation3], 1 }
 0x121   :  { %258 = vsyncpa [#allocation6], 1 }
 0x122   :  { %259 = vsyncpa [#allocation4], 1 }

</bundles_post_ra>
